<compile_context>
chip_gen: v5e
topology: v5e:2x2
jax: 0.10.0
libtpu: 0.0.40
codegen_flags: <defaults>
</compile_context>

<pallas_src>
import functools

import jax
import jax.numpy as jnp
from jax.experimental import pallas as pl
from jax.experimental.pallas import tpu as pltpu


def _copy_kernel(x_ref, o_ref):
    # Both refs are (TB, cpg, S2, S1).  The channel shuffle already happened in
    # the BlockSpec index_maps, so this is a pure whole-block copy.
    # (Default 2-deep buffering; bump via pipeline_mode=pl.Buffered(3) only if
    #  a trace shows exposed DMA.)
    o_ref[...] = x_ref[...]


def _spatial_factors(hw: int) -> tuple[int, int]:
    """Factor hw = s2 * s1 minimizing (8, 128) register-tile padding.

    Prefers the largest lane dim s1 among ties (lane-dense layout).
    """
    best_key, best = None, (1, hw)
    for s1 in range(1, hw + 1):
        if hw % s1:
            continue
        s2 = hw // s1
        padded = ((s2 + 7) // 8) * 8 * (((s1 + 127) // 128) * 128)
        key = (padded, -s1)
        if best_key is None or key < best_key:
            best_key, best = key, (s2, s1)
    return best


def channel_shuffle(x, groups: int = 4):
    """ShuffleNet channel shuffle of an NCHW array, as a Pallas TPU kernel."""
    b, c, h, w = x.shape
    if c % groups != 0:
        raise ValueError(f"channels ({c}) must be divisible by groups ({groups})")
    cpg = c // groups
    hw = h * w

    # Lane-dense spatial factorization (S2 = sublane-ish dim, S1 = lane dim).
    s2, s1 = _spatial_factors(hw)

    # Padded per-block VMEM footprint (accounts for (8, 128) tiling).
    itemsize = jnp.dtype(x.dtype).itemsize
    padded_spatial = ((s2 + 7) // 8) * 8 * (((s1 + 127) // 128) * 128)
    per_batch_bytes = cpg * padded_spatial * itemsize

    # Pack batch elements per block up to ~2 MiB; tb must divide b.
    target_block = 2 << 20
    tb = max(1, min(b, target_block // max(per_batch_bytes, 1)))
    while b % tb:
        tb -= 1
    # Keep the leading parallel axis >= 2 when possible (v7x has 2 TCs/chip).
    if b >= 2 and b // tb < 2:
        tb = max(d for d in range(1, b // 2 + 1) if b % d == 0)
    grid_b = b // tb
    block_bytes = tb * per_batch_bytes

    # ~2 in-flight buffers each for input and output; keep headroom under
    # v7x's 64 MiB physical VMEM (v5e/v6e have 128 MiB, so this is safe there).
    vmem_limit = int(min(48 << 20, max(32 << 20, 5 * block_bytes)))

    # Free metadata reshape: channels -> (G, cpg), spatial -> (S2, S1).
    x5 = x.reshape(b, groups, cpg, s2, s1)

    out5 = pl.pallas_call(
        _copy_kernel,
        out_shape=jax.ShapeDtypeStruct((b, cpg, groups, s2, s1), x.dtype),
        grid=(grid_b, groups),
        in_specs=[
            # Source: group j -> its cpg contiguous channels, full spatial tile.
            pl.BlockSpec((tb, None, cpg, s2, s1), lambda bi, j: (bi, j, 0, 0, 0)),
        ],
        # Destination: the same slab lands at output channels i*G + j (the
        # shuffle), expressed purely through the block index along axis 2.
        out_specs=pl.BlockSpec((tb, cpg, None, s2, s1), lambda bi, j: (bi, 0, j, 0, 0)),
        compiler_params=pltpu.CompilerParams(
            dimension_semantics=("parallel", "parallel"),
            vmem_limit_bytes=vmem_limit,
        ),
    )(x5)

    # Free metadata reshape back: (cpg, G) -> shuffled channel axis.
    return out5.reshape(b, c, h, w)


def _reference_channel_shuffle(x, groups=4):
    b, c, h, w = x.shape
    cpg = c // groups
    xr = x.reshape(b, groups, cpg, h, w)
    xr = jnp.transpose(xr, (0, 2, 1, 3, 4))
    return xr.reshape(b, c, h, w)


if __name__ == "__main__":
    key = jax.random.PRNGKey(0)
    B, C, H, W = 2, 4, 16, 16  # groups=4 -> channels_per_group=1
    groups = 4
    x = jax.random.normal(key, (B, C, H, W), dtype=jnp.float32)

    shuffle = jax.jit(functools.partial(channel_shuffle, groups=groups))
    out = jax.block_until_ready(shuffle(x))

    ref = _reference_channel_shuffle(x, groups=groups)
    assert out.shape == (B, C, H, W)
    assert jnp.allclose(out, ref), "mismatch vs reference channel shuffle"

    print("KERNEL_OK")
</pallas_src>

<mosaic_0001>
module attributes {stable_mosaic.version = 11 : i64} {
  func.func @_copy_kernel(%arg0: i32, %arg1: i32, %arg2: memref<1x1x1x2x128xf32, #tpu.memory_space<vmem>>, %arg3: memref<1x1x1x2x128xf32, #tpu.memory_space<vmem>>) attributes {dimension_semantics = [#tpu.dimension_semantics<parallel>, #tpu.dimension_semantics<parallel>], iteration_bounds = array<i64: 2, 4>, scalar_prefetch = 0 : i64, scratch_operands = 0 : i64, tpu.core_type = #tpu.core_type<tc>, window_params = [{transform_indices = @transform_0, window_bounds = array<i64: 1, 1, 1, 2, 128>}, {transform_indices = @transform_1, window_bounds = array<i64: 1, 1, 1, 2, 128>}]} {
    %c0 = arith.constant 0 : index
    %c0_0 = arith.constant 0 : index
    %c0_1 = arith.constant 0 : index
    %c0_2 = arith.constant 0 : index
    %c0_3 = arith.constant 0 : index
    %0 = vector.load %arg2[%c0, %c0_0, %c0_1, %c0_2, %c0_3] : memref<1x1x1x2x128xf32, #tpu.memory_space<vmem>>, vector<1x1x1x2x128xf32>
    %1 = vector.shape_cast %0 : vector<1x1x1x2x128xf32> to vector<1x1x2x128xf32>
    %c0_4 = arith.constant 0 : index
    %c0_5 = arith.constant 0 : index
    %c0_6 = arith.constant 0 : index
    %c0_7 = arith.constant 0 : index
    %c0_8 = arith.constant 0 : index
    %2 = vector.load %arg3[%c0_4, %c0_5, %c0_6, %c0_7, %c0_8] : memref<1x1x1x2x128xf32, #tpu.memory_space<vmem>>, vector<1x1x1x2x128xf32>
    %3 = vector.shape_cast %2 : vector<1x1x1x2x128xf32> to vector<1x1x2x128xf32>
    %4 = vector.shape_cast %1 : vector<1x1x2x128xf32> to vector<1x1x1x2x128xf32>
    tpu.vector_store %arg3[%c0_4, %c0_5, %c0_6, %c0_7, %c0_8], %4 {strides = array<i32>} : memref<1x1x1x2x128xf32, #tpu.memory_space<vmem>>, vector<1x1x1x2x128xf32>,
    return
  }
  func.func @transform_0(%arg0: i32, %arg1: i32) -> (i32, i32, i32, i32, i32) {
    %c0_i32 = arith.constant 0 : i32
    %c0_i32_0 = arith.constant 0 : i32
    %c0_i32_1 = arith.constant 0 : i32
    %c0_i32_2 = arith.constant 0 : i32
    return %arg0, %arg1, %c0_i32, %c0_i32_0, %c0_i32_1 : i32, i32, i32, i32, i32
  }
  func.func @transform_1(%arg0: i32, %arg1: i32) -> (i32, i32, i32, i32, i32) {
    %c0_i32 = arith.constant 0 : i32
    %c0_i32_0 = arith.constant 0 : i32
    %c0_i32_1 = arith.constant 0 : i32
    %c0_i32_2 = arith.constant 0 : i32
    return %arg0, %c0_i32, %arg1, %c0_i32_0, %c0_i32_1 : i32, i32, i32, i32, i32
  }
}

</mosaic_0001>

<bundles_post_ra>
// kernel: channel_shuffle.1
= control target key start
LH: loop header
LB: loop body
LE: loop exit
PB: predicated region body
PF: predicated region fallthrough
CT: control target
= control target key end

     0   :  { %s337_s6 = smov 0   ;;  %s339_s7 = smov 0   ;;  %s373_s0 = inlined_call_operand.vmem [shape: f32[2,4,1,2,128], index: 0, kind: input, shape index: {}]   ;;  %s374_s1 = inlined_call_operand.vmem [shape: f32[2,1,4,2,128], index: 1, kind: output, shape index: {}]  }
   0x1   :  { %s341_s8 = smov 0   ;;  %s343_s9 = smov 0  }
   0x2   :  { %s345_s10 = smov 0  }
   0x3 LB: > { %s20_s11 = sadd.s32 1, %s317_s8  ;;  %s23_s12 = sadd.s32 1, %s321_s9  ;;  %s325_s10 = sphi %s345_s10, %s11_s10   ;;  %s321_s9 = sphi %s343_s9, %s378_s9   ;;  %s317_s8 = sphi %s341_s8, %s377_s8   ;;  %s313_s7 = sphi %s339_s7, %s376_s7   ;;  %s309_s6 = sphi %s337_s6, %s375_s6  }
   0x4   : > { %p21_p0 = scmp.ge.s32.totalorder %s20_s11, 4  ;;  %p240_p1 = scmp.ge.s32.totalorder %s325_s10, 1 }
   0x5   : > { %p106_p2 = scmp.lt.s32.totalorder %s325_s10, 9 }
   0x6   : > { %s380_s11 = smov (%p21_p0, %s20_s11), 0  ;;  %s382_s12 = smov (!%p21_p0, %s23_s12), %s321_s9 }
   0x7   : > { %p107_p3 = pnand %p240_p1, %p106_p2  ;;  %p25_p4 = scmp.ge.s32.totalorder %s382_s12, 2 }
   0x8   : > { %p132_p5 = scmp.lt.s32.totalorder (!%p107_p3), %s313_s7, 1  ;;  %p134_p6 = scmp.lt.s32.totalorder (!%p107_p3), %s309_s6, 3 }
   0x9   : > { %s384_s12 = smov (%p25_p4, %s382_s12), 0  ;;  %110 = sbr.rel (%p107_p3) target bundleno = 21 (0x15), region = 24 }
   0xe   : > { %s386_s7 = smov (!%p132_p5, %s313_s7), 1  ;;  %s388_s6 = smov (!%p134_p6, %s309_s6), 3 }
   0xf   : > { %s241_s13 = sshll.u32 %s386_s7, 2 }
  0x10   : > { %s137_s14 = sadd.s32 %s241_s13, %s388_s6 }
  0x11   : > { %s242_s15 = sshll.u32 %s137_s14, 1 }
  0x12   : > { %s139_s18 = scalar_lea.vmem %s373_s0, %s242_s15  ;;  %s147_s21 = scalar_lea.vmem %s374_s1, %s242_s15 }
  0x13   : > { %v148_v0 = vld [vmem:[%s139_s18] sm:$0x3] }
  0x14   : > { %149 = vst [vmem:[%s147_s21] sm:$0x3] %v148_v0 }
  0x15 PF: > { %s11_s10 = sadd.s32 1, %s325_s10   ;;  %s375_s6 = smov %s317_s8 }
  0x16   : > { %p8_p7 = scmp.ge.s32.totalorder %s11_s10, 10   ;;  %s376_s7 = smov %s321_s9 }
  0x17   : > { %s377_s8 = smov %s380_s11  ;;  %s378_s9 = smov %s384_s12 }
  0x18   :  { %10 = sbr.rel (!%p8_p7) target bundleno = 3 (0x3), region = 54 }

</bundles_post_ra>
